<compile_context>
chip_gen: v7x
topology: tpu7x:2x2x1
jax: 0.10.0
libtpu: 0.0.40
codegen_flags: <defaults>
</compile_context>

<pallas_src>
import functools

import jax
import jax.numpy as jnp
from jax.experimental import pallas as pl
from jax.experimental.pallas import tpu as pltpu


_LANE = 128
# Target rows (B*W or N) per grid step.  512 rows x F floats, double-buffered,
# stays a few MiB -> comfortably inside v5e's 16 MiB default scoped VMEM and
# v7x's 64 MiB physical VMEM; we also raise the scoped limit to 32 MiB below.
_TARGET_TILE_ROWS = 512
_VMEM_LIMIT_BYTES = 32 * 1024 * 1024


def _round_up(x, m):
    return ((x + m - 1) // m) * m


def _mlp_kernel(*refs, n_layers, has_action, reduce_w, compute_dtype):
    """refs = (x_ref, [act_ref,] w1_traj, [w1_act,] b1, w2, b2, ..., out_ref).

    ReLU-MLP with a final linear layer (no activation); if reduce_w, the input
    block is (TB, W, F) and the per-batch sum over W is done in-kernel.
    """
    idx = 0
    x_ref = refs[idx]; idx += 1
    a_ref = None
    if has_action:
        a_ref = refs[idx]; idx += 1
    out_ref = refs[-1]
    p = refs[idx:-1]

    x = x_ref[...]
    if reduce_w:
        tb, w_len, f = x_ref.shape
        x = x.reshape(tb * w_len, f)           # W=sublane-aligned merge of leading dims
    x = x.astype(compute_dtype)

    pi = 0
    w1t = p[pi][...]; pi += 1
    # bf16 MXU matmul, f32 accumulation.
    h = jnp.dot(x, w1t, preferred_element_type=jnp.float32)
    if has_action:
        w1a = p[pi][...]; pi += 1
        a = a_ref[...]
        if reduce_w:
            a = a.reshape(tb * w_len, a_ref.shape[-1])
        h = h + jnp.dot(a.astype(compute_dtype), w1a,
                        preferred_element_type=jnp.float32)
    b1 = p[pi][...]; pi += 1
    h = h + b1
    if n_layers > 1:
        h = jnp.maximum(h, 0.0)

    for li in range(1, n_layers):
        w = p[pi][...]; pi += 1
        b = p[pi][...]; pi += 1
        h = jnp.dot(h.astype(compute_dtype), w,
                    preferred_element_type=jnp.float32) + b
        if li != n_layers - 1:                 # ReLU on all but the last layer
            h = jnp.maximum(h, 0.0)

    if reduce_w:
        out_p = out_ref.shape[-1]
        # Per-batch sum over W: sublane-axis reduction (XLU), no sel-matmul.
        out_ref[...] = h.reshape(tb, w_len, out_p).sum(axis=1, keepdims=True)
    else:
        out_ref[...] = h


class SiamFCLinearPallas:
    """JAX/Pallas re-implementation of Siam__FC_linear_nn's forward pass."""

    def __init__(self, features_len, hidden_layers_sizes, outputs,
                 action_space=None, key=jax.random.PRNGKey(0),
                 compute_dtype=jnp.bfloat16):
        features_len = int(features_len)
        self.features_len = features_len
        self._predict_with_action = action_space is not None
        self.action_space = int(action_space) if action_space is not None else 0
        self.outputs = int(outputs)
        self.compute_dtype = compute_dtype

        in_dim = features_len + self.action_space
        dims = [in_dim] + [int(h) for h in hidden_layers_sizes] + [self.outputs]

        # Reference (unpadded, f32) parameters, (in, out) layout.
        self.params = []
        for i in range(len(dims) - 1):
            fan_in, fan_out = dims[i], dims[i + 1]
            key, kw, kb = jax.random.split(key, 3)
            # weight_init: normal(0, sqrt(2/(fan_in+fan_out)))
            std = (2.0 / (fan_in + fan_out)) ** 0.5
            w = std * jax.random.normal(kw, (fan_in, fan_out), jnp.float32)
            # PyTorch Linear default bias init: U(-1/sqrt(fan_in), 1/sqrt(fan_in))
            bound = fan_in ** -0.5
            b = jax.random.uniform(kb, (1, fan_out), jnp.float32,
                                   minval=-bound, maxval=bound)
            self.params.append((w, b))
        self.n_layers = len(self.params)

        # Lane-padded kernel parameters: bf16 weights (zero-padded rows/cols so
        # padding is a mathematical no-op), f32 biases.  Layer 0 is split into
        # trajectory / action slabs so the concat can be fused in-kernel.
        padded_out = [_round_up(d, _LANE) for d in dims[1:]]
        self.out_pad = padded_out[-1]
        kparams = []
        for i, (w, b) in enumerate(self.params):
            op = padded_out[i]
            w_p = jnp.pad(w, ((0, 0), (0, op - w.shape[1])))
            if i > 0:
                ip = padded_out[i - 1]
                w_p = jnp.pad(w_p, ((0, ip - w.shape[0]), (0, 0)))
            b_p = jnp.pad(b, ((0, 0), (0, op - b.shape[1])))
            if i == 0 and self._predict_with_action:
                kparams += [w_p[:features_len].astype(compute_dtype),
                            w_p[features_len:].astype(compute_dtype),
                            b_p]
            else:
                kparams += [w_p.astype(compute_dtype), b_p]
        self._kernel_params = kparams

    # ---- pallas_call wrappers -------------------------------------------------

    def _param_specs(self):
        # Full-shape blocks with a constant index_map -> loaded once, resident.
        return [pl.BlockSpec(p.shape, lambda i, n=p.ndim: (0,) * n)
                for p in self._kernel_params]

    def _compiler_params(self):
        return pltpu.CompilerParams(dimension_semantics=("parallel",),
                                    vmem_limit_bytes=_VMEM_LIMIT_BYTES)

    def _forward_3d(self, trajectory, action):
        B, W, F = trajectory.shape
        inputs = [trajectory]
        if self._predict_with_action:
            inputs.append(action.reshape(B, W, -1))
        inputs += self._kernel_params

        # Batch tile: ~_TARGET_TILE_ROWS rows per step, and TB divides B so
        # every block is exact (no partial-block masking needed).
        TB = max(1, _TARGET_TILE_ROWS // max(W, 1))
        TB = min(TB, B)
        while B % TB:
            TB -= 1
        grid = (B // TB,)

        in_specs = [pl.BlockSpec((TB, W, F), lambda i: (i, 0, 0))]
        if self._predict_with_action:
            A = inputs[1].shape[-1]
            in_specs.append(pl.BlockSpec((TB, W, A), lambda i: (i, 0, 0)))
        in_specs += self._param_specs()

        out_shape = jax.ShapeDtypeStruct((B, 1, self.out_pad), jnp.float32)
        out_specs = pl.BlockSpec((TB, 1, self.out_pad), lambda i: (i, 0, 0))

        kernel = functools.partial(_mlp_kernel, n_layers=self.n_layers,
                                   has_action=self._predict_with_action,
                                   reduce_w=True,
                                   compute_dtype=self.compute_dtype)
        out = pl.pallas_call(kernel, out_shape=out_shape, grid=grid,
                             in_specs=in_specs, out_specs=out_specs,
                             compiler_params=self._compiler_params())(*inputs)
        # Drop the lane padding / keepdim axis: (B, outputs)
        return out[:, 0, :self.outputs]

    def _forward_2d(self, trajectory, action):
        x = trajectory
        N, F = x.shape
        inputs = [x]
        if self._predict_with_action:
            a = action
            if a.ndim == 1:
                a = a[:, None]
            inputs.append(a)
        inputs += self._kernel_params

        TN = N if N <= _TARGET_TILE_ROWS else _TARGET_TILE_ROWS
        grid = (pl.cdiv(N, TN),)

        in_specs = [pl.BlockSpec((TN, F), lambda i: (i, 0))]
        if self._predict_with_action:
            A = inputs[1].shape[-1]
            in_specs.append(pl.BlockSpec((TN, A), lambda i: (i, 0)))
        in_specs += self._param_specs()

        out_shape = jax.ShapeDtypeStruct((N, self.out_pad), jnp.float32)
        out_specs = pl.BlockSpec((TN, self.out_pad), lambda i: (i, 0))

        kernel = functools.partial(_mlp_kernel, n_layers=self.n_layers,
                                   has_action=self._predict_with_action,
                                   reduce_w=False,
                                   compute_dtype=self.compute_dtype)
        out = pl.pallas_call(kernel, out_shape=out_shape, grid=grid,
                             in_specs=in_specs, out_specs=out_specs,
                             compiler_params=self._compiler_params())(*inputs)
        return out[:, :self.outputs]

    def __call__(self, trajectory, action=None):
        if trajectory.ndim == 2:
            return self._forward_2d(trajectory, action)
        return self._forward_3d(trajectory, action)


# ---- references for correctness checking -------------------------------------

def _reference_f32(model, trajectory, action):
    """Full-f32 reference (exact module semantics)."""
    B, W = trajectory.shape[0], trajectory.shape[1]
    x = trajectory.reshape(B * W, -1).astype(jnp.float32)
    if model._predict_with_action:
        x = jnp.concatenate([x, action.reshape(B * W, -1).astype(jnp.float32)],
                            axis=1)
    h = x
    for i, (w, b) in enumerate(model.params):
        h = h @ w + b
        if i != model.n_layers - 1:
            h = jnp.maximum(h, 0.0)
    return h.reshape(B, W, -1).sum(axis=1)


def _reference_matched(model, trajectory, action):
    """Pure-JAX reference mirroring the kernel's bf16-matmul / f32-accum numerics."""
    cd = model.compute_dtype
    B, W = trajectory.shape[0], trajectory.shape[1]
    F = model.features_len
    xt = trajectory.reshape(B * W, -1).astype(cd)
    w1, b1 = model.params[0]
    h = jnp.dot(xt, w1[:F].astype(cd), preferred_element_type=jnp.float32)
    if model._predict_with_action:
        xa = action.reshape(B * W, -1).astype(cd)
        h = h + jnp.dot(xa, w1[F:].astype(cd), preferred_element_type=jnp.float32)
    h = h + b1
    if model.n_layers > 1:
        h = jnp.maximum(h, 0.0)
    for i in range(1, model.n_layers):
        w, b = model.params[i]
        h = jnp.dot(h.astype(cd), w.astype(cd),
                    preferred_element_type=jnp.float32) + b
        if i != model.n_layers - 1:
            h = jnp.maximum(h, 0.0)
    return h.reshape(B, W, -1).sum(axis=1)


if __name__ == "__main__":
    # Small shapes consistent with the module's forward:
    #   trajectory: (B=2, W=8, features_len=16), action: (B=2, W=8, action_space=4)
    features_len = 16
    action_space = 4
    hidden_layers_sizes = [32, 32]
    outputs = 1
    B, W = 2, 8

    key = jax.random.PRNGKey(0)
    k_traj, k_act, k_params = jax.random.split(key, 3)
    trajectory = jax.random.normal(k_traj, (B, W, features_len), jnp.float32)
    action = jax.random.normal(k_act, (B, W, action_space), jnp.float32)

    model = SiamFCLinearPallas(features_len, hidden_layers_sizes, outputs,
                               action_space=action_space, key=k_params)

    sum_rewards = jax.block_until_ready(model(trajectory, action))
    assert sum_rewards.shape == (B, 1)

    ref_matched = _reference_matched(model, trajectory, action)
    assert jnp.allclose(sum_rewards, ref_matched, atol=1e-3, rtol=1e-3), \
        "kernel does not match bf16-matched reference"

    ref_f32 = _reference_f32(model, trajectory, action)
    assert jnp.allclose(sum_rewards, ref_f32, atol=5e-2, rtol=5e-2), \
        "kernel deviates too much from full-f32 reference"

    # Also exercise the 2-D (single trajectory, no W-sum) path.
    single = jax.random.normal(jax.random.PRNGKey(1), (W, features_len), jnp.float32)
    single_act = jax.random.normal(jax.random.PRNGKey(2), (W, action_space), jnp.float32)
    out2d = jax.block_until_ready(model(single, single_act))
    assert out2d.shape == (W, outputs)

    print("KERNEL_OK")
</pallas_src>

<mosaic_0001>
module attributes {stable_mosaic.version = 11 : i64} {
  func.func @_mlp_kernel(%arg0: i32, %arg1: memref<2x8x16xf32, #tpu.memory_space<vmem>>, %arg2: memref<2x8x4xf32, #tpu.memory_space<vmem>>, %arg3: memref<16x128xbf16, #tpu.memory_space<vmem>>, %arg4: memref<4x128xbf16, #tpu.memory_space<vmem>>, %arg5: memref<1x128xf32, #tpu.memory_space<vmem>>, %arg6: memref<128x128xbf16, #tpu.memory_space<vmem>>, %arg7: memref<1x128xf32, #tpu.memory_space<vmem>>, %arg8: memref<128x128xbf16, #tpu.memory_space<vmem>>, %arg9: memref<1x128xf32, #tpu.memory_space<vmem>>, %arg10: memref<2x1x128xf32, #tpu.memory_space<vmem>>) attributes {dimension_semantics = [#tpu.dimension_semantics<parallel>], iteration_bounds = array<i64: 1>, scalar_prefetch = 0 : i64, scratch_operands = 0 : i64, tpu.core_type = #tpu.core_type<tc>, window_params = [{transform_indices = @transform_0, window_bounds = array<i64: 2, 8, 16>}, {transform_indices = @transform_1, window_bounds = array<i64: 2, 8, 4>}, {pipeline_mode = #tpu.pipeline_mode<synchronous>, transform_indices = @transform_2, window_bounds = array<i64: 16, 128>}, {pipeline_mode = #tpu.pipeline_mode<synchronous>, transform_indices = @transform_3, window_bounds = array<i64: 4, 128>}, {pipeline_mode = #tpu.pipeline_mode<synchronous>, transform_indices = @transform_4, window_bounds = array<i64: 1, 128>}, {pipeline_mode = #tpu.pipeline_mode<synchronous>, transform_indices = @transform_5, window_bounds = array<i64: 128, 128>}, {pipeline_mode = #tpu.pipeline_mode<synchronous>, transform_indices = @transform_6, window_bounds = array<i64: 1, 128>}, {pipeline_mode = #tpu.pipeline_mode<synchronous>, transform_indices = @transform_7, window_bounds = array<i64: 128, 128>}, {pipeline_mode = #tpu.pipeline_mode<synchronous>, transform_indices = @transform_8, window_bounds = array<i64: 1, 128>}, {transform_indices = @transform_9, window_bounds = array<i64: 2, 1, 128>}]} {
    %c0 = arith.constant 0 : index
    %c0_0 = arith.constant 0 : index
    %c0_1 = arith.constant 0 : index
    %0 = vector.load %arg1[%c0, %c0_0, %c0_1] : memref<2x8x16xf32, #tpu.memory_space<vmem>>, vector<2x8x16xf32>
    %1 = vector.shape_cast %0 : vector<2x8x16xf32> to vector<16x16xf32>
    %2 = arith.truncf %1 : vector<16x16xf32> to vector<16x16xbf16>
    %c0_2 = arith.constant 0 : index
    %c0_3 = arith.constant 0 : index
    %3 = vector.load %arg3[%c0_2, %c0_3] : memref<16x128xbf16, #tpu.memory_space<vmem>>, vector<16x128xbf16>
    %cst = arith.constant dense<0.000000e+00> : vector<16x128xf32>
    %4 = tpu.matmul %2, %3, %cst {dimension_numbers = #tpu.dot_dimension_numbers<[1], [0], [0], [1], [0, 0, 1, 1], [], []>} : vector<16x16xbf16>, vector<16x128xbf16>, vector<16x128xf32> -> vector<16x128xf32>
    %c0_4 = arith.constant 0 : index
    %c0_5 = arith.constant 0 : index
    %5 = vector.load %arg4[%c0_4, %c0_5] : memref<4x128xbf16, #tpu.memory_space<vmem>>, vector<4x128xbf16>
    %c0_6 = arith.constant 0 : index
    %c0_7 = arith.constant 0 : index
    %c0_8 = arith.constant 0 : index
    %6 = vector.load %arg2[%c0_6, %c0_7, %c0_8] : memref<2x8x4xf32, #tpu.memory_space<vmem>>, vector<2x8x4xf32>
    %7 = vector.shape_cast %6 : vector<2x8x4xf32> to vector<16x4xf32>
    %8 = arith.truncf %7 : vector<16x4xf32> to vector<16x4xbf16>
    %cst_9 = arith.constant dense<0.000000e+00> : vector<16x128xf32>
    %9 = tpu.matmul %8, %5, %cst_9 {dimension_numbers = #tpu.dot_dimension_numbers<[1], [0], [0], [1], [0, 0, 1, 1], [], []>} : vector<16x4xbf16>, vector<4x128xbf16>, vector<16x128xf32> -> vector<16x128xf32>
    %10 = arith.addf %4, %9 : vector<16x128xf32>
    %c0_10 = arith.constant 0 : index
    %c0_11 = arith.constant 0 : index
    %11 = vector.load %arg5[%c0_10, %c0_11] : memref<1x128xf32, #tpu.memory_space<vmem>>, vector<1x128xf32>
    %12 = vector.broadcast %11 : vector<1x128xf32> to vector<16x128xf32>
    %13 = arith.addf %10, %12 : vector<16x128xf32>
    %cst_12 = arith.constant 0.000000e+00 : f32
    %14 = vector.broadcast %cst_12 : f32 to vector<16x128xf32>
    %15 = arith.maximumf %13, %14 : vector<16x128xf32>
    %c0_13 = arith.constant 0 : index
    %c0_14 = arith.constant 0 : index
    %16 = vector.load %arg6[%c0_13, %c0_14] : memref<128x128xbf16, #tpu.memory_space<vmem>>, vector<128x128xbf16>
    %c0_15 = arith.constant 0 : index
    %c0_16 = arith.constant 0 : index
    %17 = vector.load %arg7[%c0_15, %c0_16] : memref<1x128xf32, #tpu.memory_space<vmem>>, vector<1x128xf32>
    %18 = arith.truncf %15 : vector<16x128xf32> to vector<16x128xbf16>
    %cst_17 = arith.constant dense<0.000000e+00> : vector<16x128xf32>
    %19 = tpu.matmul %18, %16, %cst_17 {dimension_numbers = #tpu.dot_dimension_numbers<[1], [0], [0], [1], [0, 0, 1, 1], [], []>} : vector<16x128xbf16>, vector<128x128xbf16>, vector<16x128xf32> -> vector<16x128xf32>
    %20 = vector.broadcast %17 : vector<1x128xf32> to vector<16x128xf32>
    %21 = arith.addf %19, %20 : vector<16x128xf32>
    %cst_18 = arith.constant 0.000000e+00 : f32
    %22 = vector.broadcast %cst_18 : f32 to vector<16x128xf32>
    %23 = arith.maximumf %21, %22 : vector<16x128xf32>
    %c0_19 = arith.constant 0 : index
    %c0_20 = arith.constant 0 : index
    %24 = vector.load %arg8[%c0_19, %c0_20] : memref<128x128xbf16, #tpu.memory_space<vmem>>, vector<128x128xbf16>
    %c0_21 = arith.constant 0 : index
    %c0_22 = arith.constant 0 : index
    %25 = vector.load %arg9[%c0_21, %c0_22] : memref<1x128xf32, #tpu.memory_space<vmem>>, vector<1x128xf32>
    %26 = arith.truncf %23 : vector<16x128xf32> to vector<16x128xbf16>
    %cst_23 = arith.constant dense<0.000000e+00> : vector<16x128xf32>
    %27 = tpu.matmul %26, %24, %cst_23 {dimension_numbers = #tpu.dot_dimension_numbers<[1], [0], [0], [1], [0, 0, 1, 1], [], []>} : vector<16x128xbf16>, vector<128x128xbf16>, vector<16x128xf32> -> vector<16x128xf32>
    %28 = vector.broadcast %25 : vector<1x128xf32> to vector<16x128xf32>
    %29 = arith.addf %27, %28 : vector<16x128xf32>
    %30 = vector.shape_cast %29 : vector<16x128xf32> to vector<2x8x128xf32>
    %cst_24 = arith.constant dense<0.000000e+00> : vector<2x128xf32>
    %31 = vector.multi_reduction <add>, %30, %cst_24 [1] : vector<2x8x128xf32> to vector<2x128xf32>
    %32 = vector.shape_cast %31 : vector<2x128xf32> to vector<2x1x128xf32>
    %c0_25 = arith.constant 0 : index
    %c0_26 = arith.constant 0 : index
    %c0_27 = arith.constant 0 : index
    %33 = vector.load %arg10[%c0_25, %c0_26, %c0_27] : memref<2x1x128xf32, #tpu.memory_space<vmem>>, vector<2x1x128xf32>
    tpu.vector_store %arg10[%c0_25, %c0_26, %c0_27], %32 {strides = array<i32>} : memref<2x1x128xf32, #tpu.memory_space<vmem>>, vector<2x1x128xf32>,
    return
  }
  func.func @transform_0(%arg0: i32) -> (i32, i32, i32) {
    %c0_i32 = arith.constant 0 : i32
    %c0_i32_0 = arith.constant 0 : i32
    %c0_i32_1 = arith.constant 0 : i32
    return %arg0, %c0_i32, %c0_i32_0 : i32, i32, i32
  }
  func.func @transform_1(%arg0: i32) -> (i32, i32, i32) {
    %c0_i32 = arith.constant 0 : i32
    %c0_i32_0 = arith.constant 0 : i32
    %c0_i32_1 = arith.constant 0 : i32
    return %arg0, %c0_i32, %c0_i32_0 : i32, i32, i32
  }
  func.func @transform_2(%arg0: i32) -> (i32, i32) {
    %c0_i32 = arith.constant 0 : i32
    %c0_i32_0 = arith.constant 0 : i32
    %c0_i32_1 = arith.constant 0 : i32
    return %c0_i32, %c0_i32_0 : i32, i32
  }
  func.func @transform_3(%arg0: i32) -> (i32, i32) {
    %c0_i32 = arith.constant 0 : i32
    %c0_i32_0 = arith.constant 0 : i32
    %c0_i32_1 = arith.constant 0 : i32
    return %c0_i32, %c0_i32_0 : i32, i32
  }
  func.func @transform_4(%arg0: i32) -> (i32, i32) {
    %c0_i32 = arith.constant 0 : i32
    %c0_i32_0 = arith.constant 0 : i32
    %c0_i32_1 = arith.constant 0 : i32
    return %c0_i32, %c0_i32_0 : i32, i32
  }
  func.func @transform_5(%arg0: i32) -> (i32, i32) {
    %c0_i32 = arith.constant 0 : i32
    %c0_i32_0 = arith.constant 0 : i32
    %c0_i32_1 = arith.constant 0 : i32
    return %c0_i32, %c0_i32_0 : i32, i32
  }
  func.func @transform_6(%arg0: i32) -> (i32, i32) {
    %c0_i32 = arith.constant 0 : i32
    %c0_i32_0 = arith.constant 0 : i32
    %c0_i32_1 = arith.constant 0 : i32
    return %c0_i32, %c0_i32_0 : i32, i32
  }
  func.func @transform_7(%arg0: i32) -> (i32, i32) {
    %c0_i32 = arith.constant 0 : i32
    %c0_i32_0 = arith.constant 0 : i32
    %c0_i32_1 = arith.constant 0 : i32
    return %c0_i32, %c0_i32_0 : i32, i32
  }
  func.func @transform_8(%arg0: i32) -> (i32, i32) {
    %c0_i32 = arith.constant 0 : i32
    %c0_i32_0 = arith.constant 0 : i32
    %c0_i32_1 = arith.constant 0 : i32
    return %c0_i32, %c0_i32_0 : i32, i32
  }
  func.func @transform_9(%arg0: i32) -> (i32, i32, i32) {
    %c0_i32 = arith.constant 0 : i32
    %c0_i32_0 = arith.constant 0 : i32
    %c0_i32_1 = arith.constant 0 : i32
    return %arg0, %c0_i32, %c0_i32_0 : i32, i32, i32
  }
}

</mosaic_0001>

<bundles_post_ra>
// kernel: tpu_custom_call.1
= control target key start
LH: loop header
LB: loop body
LE: loop exit
PB: predicated region body
PF: predicated region fallthrough
CT: control target
= control target key end

     0   :  { %14 = vsyncpa [#allocation3], 0  ;;  %s784_s0 = inlined_call_operand.vmem [shape: f32[2,8,16], index: 0, kind: input, shape index: {}]   ;;  %s785_s1 = inlined_call_operand.vmem [shape: f32[2,8,4], index: 1, kind: input, shape index: {}]   ;;  %s786_s2 = inlined_call_operand.vmem [shape: bf16[16,128], index: 2, kind: input, shape index: {}]   ;;  %s787_s3 = inlined_call_operand.vmem [shape: bf16[4,128], index: 3, kind: input, shape index: {}]   ;;  %s788_s4 = inlined_call_operand.vmem [shape: f32[1,128], index: 4, kind: input, shape index: {}]   ;;  %s789_s5 = inlined_call_operand.hbm [shape: bf16[128,128], index: 5, kind: input, shape index: {}]   ;;  %s790_s6 = inlined_call_operand.vmem [shape: f32[1,128], index: 6, kind: input, shape index: {}]   ;;  %s791_s7 = inlined_call_operand.hbm [shape: bf16[128,128], index: 7, kind: input, shape index: {}]   ;;  %s792_s8 = inlined_call_operand.vmem [shape: f32[1,128], index: 8, kind: input, shape index: {}]   ;;  %s793_s9 = inlined_call_operand.hbm [shape: f32[2,1,128], index: 9, kind: output, shape index: {}]  }
   0x1   :  { %15 = vsyncpa [#allocation6], 0 }
   0x2   :  { %16 = vsyncpa [#allocation4], 0  ;;  %s636_s30 = smov [#allocation2]   ;;  %s564_s13 = scalar_lea.hbm %s789_s5, 1024 }
   0x3   :  { %s32_s10 = sshll.u32 %s636_s30, 4  ;;  %p565_p0 = scmp.ne.s32.totalorder %s789_s5, %s564_s13  ;;  %s33_s10 = int_to_ptr.vmem [resolvable:$true] %s32_s10 }
   0x4   :  { %p568_p1 = scmp.lt.u32.totalorder %s564_s13, %s789_s5 }
   0x6   :  { %p570_p2 = pnand %p568_p1, %p565_p0 }
   0x8   :  { %573 = shalt.err (!%p570_p2)
}
   0x9   :  { %s574_s18 = scalar_lea.vmem %s33_s10, 1024  ;;  %p579_p4 = scmp.lt.s32.totalorder %s33_s10, %s33_s10 }
   0xa   :  { %p575_p3 = scmp.ne.s32.totalorder %s33_s10, %s574_s18  ;;  %p580_p5 = scmp.lt.s32.totalorder %s574_s18, %s574_s18 }
   0xc   :  { %p581_p6 = por %p580_p5, %p579_p4 }
   0xe   :  { %p582_p7 = pnand %p581_p6, %p575_p3 }
  0x10   :  { %585 = shalt.err (!%p582_p7)
}
  0x11   :  { %s637_s19 = smov 64   ;;  %s638_s20 = smov 4  }
  0x12   :  { %38 = dma.hbm_to_vmem [thread:$0]  %s789_s5, 1024, %s33_s10, [#allocation3], %s637_s19, %s637_s19, %s638_s20  }
  0x13   :  { %s639_s23 = smov [#allocation5]   ;;  %s586_s27 = scalar_lea.hbm %s791_s7, 1024 }
  0x14   :  { %s46_s24 = sshll.u32 %s639_s23, 4  ;;  %p587_p8 = scmp.ne.s32.totalorder %s791_s7, %s586_s27  ;;  %s47_s24 = int_to_ptr.vmem [resolvable:$true] %s46_s24 }
  0x15   :  { %p590_p9 = scmp.lt.u32.totalorder %s586_s27, %s791_s7 }
  0x17   :  { %p592_p10 = pnand %p590_p9, %p587_p8 }
  0x19   :  { %595 = shalt.err (!%p592_p10)
}
  0x1a   :  { %s596_s12 = scalar_lea.vmem %s47_s24, 1024  ;;  %p601_p12 = scmp.lt.s32.totalorder %s47_s24, %s47_s24 }
  0x1b   :  { %p597_p11 = scmp.ne.s32.totalorder %s47_s24, %s596_s12  ;;  %p602_p13 = scmp.lt.s32.totalorder %s596_s12, %s596_s12 }
  0x1d   :  { %p603_p0 = por %p602_p13, %p601_p12 }
  0x1f   :  { %p604_p1 = pnand %p603_p0, %p597_p11 }
  0x21   :  { %607 = shalt.err (!%p604_p1)
}
  0x22   :  { %52 = dma.hbm_to_vmem [thread:$0]  %s791_s7, 1024, %s47_s24, [#allocation6], %s637_s19, %s637_s19, %s638_s20  }
  0x23   :  { %630 = dma.done.wait [#allocation3], 1024  }
  0x24   :  { %631 = vsyncadd [#allocation3], 4294966272 }
  0x25   :  { %632 = dma.done.wait [#allocation6], 1024  }
  0x26   :  { %633 = vsyncadd [#allocation6], 4294966272  ;;  %v640_v0 = vmov 0.0   ;;  %vm641_vm0 = vmmov 0   ;;  %vm75_vm1 = vcmask 1041408   ;;  %v547_v3 = vld [vmem:[%s786_s2] sm:$0xff]  }
  0x27   :  { %486 = vmatprep.subr.bf16.mxu0 %v640_v0  ;;  %492 = vmatprep.subr.bf16.mxu1 %v640_v0  ;;  %v67_v1 = vld [vmem:[%s787_s3] sm:$0x3]  ;;  %v69_v5 = vld [vmem:[%s785_s1 + $0x8] sm:$0xff]  ;;  %vm71_vm2 = vcmask 31744   ;;  %vm126_vm3 = vcmask 130048   ;;  %v550_v12 = vld [vmem:[#allocation2 + $0x10] sm:$0xff]  }
  0x28   :  { %488 = vmatprep.mubr.msk.bf16.mxu0 %vm641_vm0, %v640_v0  ;;  %494 = vmatprep.mubr.msk.bf16.mxu1 %vm641_vm0, %v640_v0  ;;  %v77_v2 = vsel %vm75_vm1, %v67_v1, 0  ;;  %v68_v4 = vld [vmem:[%s785_s1] sm:$0xff]  ;;  %v63_v8 = vld [vmem:[%s784_s0 + $0x8] sm:$0xff]  ;;  %v551_v13 = vld [vmem:[#allocation2 + $0x18] sm:$0xff]  }
  0x29   :  { %487 = vmatpush3.bf16.msra.mxu0 %v77_v2  ;;  %v70_v6 = vpack.c.bf16 %v69_v5, %v68_v4  ;;  %v62_v7 = vld [vmem:[%s784_s0] sm:$0xff]  ;;  %493 = vmatpush3.bf16.msra.mxu1 %v547_v3  ;;  %v549_v11 = vld [vmem:[#allocation2 + $0x8] sm:$0xff]   ;;  %v554_v16 = vld [vmem:[#allocation2 + $0x30] sm:$0xff]  }
  0x2a   :  { %v64_v9 = vpack.c.bf16 %v63_v8, %v62_v7  ;;  %498 = vmatprep.subr.bf16.mxu0 %v640_v0  ;;  %v548_v10 = vld [vmem:[#allocation2] sm:$0xff]   ;;  %518 = vmatprep.subr.bf16.mxu1 %v640_v0  ;;  %v553_v15 = vld [vmem:[#allocation2 + $0x28] sm:$0xff]   ;;  %v555_v17 = vld [vmem:[#allocation2 + $0x38] sm:$0xff]  }
  0x2b   :  { %v552_v14 = vld [vmem:[#allocation2 + $0x20] sm:$0xff]   ;;  %v557_v19 = vld [vmem:[#allocation5 + $0x8] sm:$0xff]   ;;  %v558_v20 = vld [vmem:[#allocation5 + $0x10] sm:$0xff]  }
  0x2c   :  { %489 = vmatmul.mubr.msk.bf16.vlgmr.msra.gmra.mrb[0].mxu0 %vm71_vm2, %v70_v6  ;;  %495 = vmatmul.mubr.msk.bf16.vlgmr.msra.gmra.mrb[0].mxu1 %vm126_vm3, %v64_v9  ;;  %v556_v18 = vld [vmem:[#allocation5] sm:$0xff]   ;;  %v559_v21 = vld [vmem:[#allocation5 + $0x18] sm:$0xff]   ;;  %v561_v23 = vld [vmem:[#allocation5 + $0x28] sm:$0xff]  }
  0x2d   :  { %499 = vmatpush3.bf16.msra.mxu0 %v548_v10  ;;  %514 = vmatprep.mubr.msk.bf16.mxu0 %vm641_vm0, %v640_v0  ;;  %v560_v22 = vld [vmem:[#allocation5 + $0x20] sm:$0xff]   ;;  %v562_v40 = vld [vmem:[#allocation5 + $0x30] sm:$0xff]   ;;  %v563_v41 = vld [vmem:[#allocation5 + $0x38] sm:$0xff]  }
  0x2e   :  { %500 = vmatprep.subr.bf16.mxu0 %v640_v0  ;;  %534 = vmatprep.mubr.msk.bf16.mxu1 %vm641_vm0, %v640_v0  ;;  %v445_v27 = vld [vmem:[%s788_s4] ss:$0 sm:$0xff] }
  0x2f   :  { %519 = vmatpush3.bf16.msra.mxu1 %v556_v18  ;;  %v446_v42 = vld [vmem:[%s790_s6] ss:$0 sm:$0xff]  ;;  %s642_s6 = smov [#allocation7]  }
  0x30   :  { %520 = vmatprep.subr.bf16.mxu1 %v640_v0  ;;  %v455_v52 = vld [vmem:[%s792_s8] ss:$0 sm:$0xff]  ;;  %s429_s25 = sshll.u32 %s642_s6, 4  ;;  %s430_s25 = int_to_ptr.vmem [resolvable:$true] %s429_s25 }
  0x31   :  { %501 = vmatpush3.bf16.msra.mxu0 %v549_v11  ;;  %s608_s8 = scalar_lea.vmem %s430_s25, 32  ;;  %p613_p3 = scmp.lt.s32.totalorder %s430_s25, %s430_s25 }
  0x32   :  { %502 = vmatprep.subr.bf16.mxu0 %v640_v0  ;;  %p609_p2 = scmp.ne.s32.totalorder %s430_s25, %s608_s8  ;;  %p614_p4 = scmp.lt.s32.totalorder %s608_s8, %s608_s8 }
  0x33   :  { %521 = vmatpush3.bf16.msra.mxu1 %v557_v19 }
  0x34   :  { %522 = vmatprep.subr.bf16.mxu1 %v640_v0  ;;  %p615_p5 = por %p614_p4, %p613_p3 }
  0x35   :  { %503 = vmatpush3.bf16.msra.mxu0 %v550_v12 }
  0x36   :  { %504 = vmatprep.subr.bf16.mxu0 %v640_v0  ;;  %p616_p6 = pnand %p615_p5, %p609_p2 }
  0x37   :  { %523 = vmatpush3.bf16.msra.mxu1 %v558_v20 }
  0x38   :  { %524 = vmatprep.subr.bf16.mxu1 %v640_v0 }
  0x39   :  { %505 = vmatpush3.bf16.msra.mxu0 %v551_v13 }
  0x3a   :  { %506 = vmatprep.subr.bf16.mxu0 %v640_v0 }
  0x3b   :  { %525 = vmatpush3.bf16.msra.mxu1 %v559_v21 }
  0x3c   :  { %526 = vmatprep.subr.bf16.mxu1 %v640_v0 }
  0x3d   :  { %507 = vmatpush3.bf16.msra.mxu0 %v552_v14 }
  0x3e   :  { %508 = vmatprep.subr.bf16.mxu0 %v640_v0 }
  0x3f   :  { %527 = vmatpush3.bf16.msra.mxu1 %v560_v22 }
  0x40   :  { %528 = vmatprep.subr.bf16.mxu1 %v640_v0 }
  0x41   :  { %509 = vmatpush3.bf16.msra.mxu0 %v553_v15 }
  0x42   :  { %510 = vmatprep.subr.bf16.mxu0 %v640_v0 }
  0x43   :  { %529 = vmatpush3.bf16.msra.mxu1 %v561_v23 }
  0x44   :  { %530 = vmatprep.subr.bf16.mxu1 %v640_v0 }
  0x45   :  { %511 = vmatpush3.bf16.msra.mxu0 %v554_v16 }
  0x46   :  { %512 = vmatprep.subr.bf16.mxu0 %v640_v0 }
  0x47   :  { %531 = vmatpush3.bf16.msra.mxu1 %v562_v40 }
  0x48   :  { %532 = vmatprep.subr.bf16.mxu1 %v640_v0 }
  0x49   :  { %513 = vmatpush3.bf16.msra.mxu0 %v555_v17 }
  0x4b   :  { %533 = vmatpush3.bf16.msra.mxu1 %v563_v41 }
  0xff   :  { %v113_v24 = vpop.f32.mrb[0].mxu0  ;;  %v164_v26 = vpop.f32.mrb[0].mxu1 }
 0x100   :  { %v490_v25 = vpop.f32.mrb[1].mxu0  ;;  %v165_v28 = vadd.f32 %v164_v26, %v113_v24  ;;  %v496_v30 = vpop.f32.mrb[1].mxu1 }
 0x101   :  { %v116_v29 = vpop.f32.mrb[2].mxu0  ;;  %v167_v32 = vpop.f32.mrb[2].mxu1 }
 0x102   :  { %v491_v31 = vpop.f32.mrb[3].mxu0  ;;  %v178_v33 = vadd.f32 %v445_v27, %v165_v28  ;;  %v168_v34 = vadd.f32 %v167_v32, %v116_v29  ;;  %v497_v35 = vpop.f32.mrb[3].mxu1 }
 0x104   :  { %v179_v36 = vadd.f32 %v445_v27, %v168_v34  ;;  %v180_v37 = vmax.f32 %v178_v33, 0.0 }
 0x106   :  { %v181_v38 = vmax.f32 %v179_v36, 0.0 }
 0x108   :  { %v199_v39 = vpack.c.bf16 %v181_v38, %v180_v37 }
 0x10a   :  { %515 = vmatmul.mubr.bf16.vlgmr.msra.gmra.mrb[4].mxu0 %v199_v39 }
 0x1dd   :  { %v288_v43 = vpop.f32.mrb[4].mxu0 }
 0x1de   :  { %v289_v44 = vadd.f32 %v446_v42, %v288_v43  ;;  %v516_v45 = vpop.f32.mrb[5].mxu0 }
 0x1df   :  { %v291_v46 = vpop.f32.mrb[6].mxu0 }
 0x1e0   :  { %v292_v47 = vadd.f32 %v446_v42, %v291_v46  ;;  %v517_v48 = vpop.f32.mrb[7].mxu0  ;;  %v295_v49 = vmax.f32 %v289_v44, 0.0 }
 0x1e2   :  { %v296_v50 = vmax.f32 %v292_v47, 0.0 }
 0x1e4   :  { %v314_v51 = vpack.c.bf16 %v296_v50, %v295_v49 }
 0x1e6   :  { %535 = vmatmul.mubr.bf16.vlgmr.msra.gmra.mrb[4].mxu1 %v314_v51 }
 0x2b9   :  { %v403_v53 = vpop.f32.mrb[4].mxu1 }
 0x2ba   :  { %v404_v54 = vadd.f32 %v455_v52, %v403_v53  ;;  %v536_v55 = vpop.f32.mrb[5].mxu1 }
 0x2bb   :  { %v406_v56 = vpop.f32.mrb[6].mxu1 }
 0x2bc   :  { %v410_v57 = vrot.slane %v404_v54, 4  ;;  %v407_v58 = vadd.f32 %v455_v52, %v406_v56  ;;  %v537_v59 = vpop.f32.mrb[7].mxu1 }
 0x2be   :  { %v411_v60 = vadd.f32 %v410_v57, %v404_v54  ;;  %v416_v61 = vrot.slane %v407_v58, 4 }
 0x2c0   :  { %v412_v62 = vrot.slane %v411_v60, 2  ;;  %v417_v63 = vadd.f32 %v416_v61, %v407_v58 }
 0x2c2   :  { %v413_v0 = vadd.f32 %v412_v62, %v411_v60  ;;  %v418_v1 = vrot.slane %v417_v63, 2 }
 0x2c4   :  { %v414_v2 = vrot.slane %v413_v0, 1  ;;  %v419_v3 = vadd.f32 %v418_v1, %v417_v63 }
 0x2c6   :  { %v415_v4 = vadd.f32 %v414_v2, %v413_v0  ;;  %v420_v5 = vrot.slane %v419_v3, 1 }
 0x2c8   :  { %422 = vst [vmem:[#allocation7] sm:$0x1] %v415_v4  ;;  %v421_v6 = vadd.f32 %v420_v5, %v419_v3 }
 0x2ca   :  { %423 = vst [vmem:[#allocation7 + $0x1] sm:$0x1] %v421_v6 }
 0x2cb   :  { %619 = shalt.err (!%p616_p6)
}
 0x2cc   :  { %s620_s28 = scalar_lea.hbm %s793_s9, 32 }
 0x2cd   :  { %p621_p7 = scmp.ne.s32.totalorder %s793_s9, %s620_s28  ;;  %p624_p8 = scmp.lt.u32.totalorder %s620_s28, %s793_s9 }
 0x2cf   :  { %p626_p9 = pnand %p624_p8, %p621_p7 }
 0x2d1   :  { %629 = shalt.err (!%p626_p9)
}
 0x2d2   :  { %s643_s5 = smov 16   ;;  %s644_s10 = smov 1  }
 0x2d3   :  { %435 = dma.vmem_to_hbm [thread:$0]  %s430_s25, 32, %s793_s9, [#allocation4], %s643_s5, %s643_s5, %s644_s10  }
 0x2d4   :  { %634 = dma.done.wait [#allocation4], 32  }
 0x2d5   :  { %635 = vsyncadd [#allocation4], 4294967264 }
 0x2d6   :  { %439 = vsyncpa [#allocation3], 1 }
 0x2d7   :  { %440 = vsyncpa [#allocation6], 1 }
 0x2d8   :  { %441 = vsyncpa [#allocation4], 1 }

</bundles_post_ra>
